<compile_context>
chip_gen: v7x
topology: tpu7x:2x2x1
jax: 0.10.0
libtpu: 0.0.40
codegen_flags: <defaults>
</compile_context>

<pallas_src>
import functools
import math

import jax
import jax.numpy as jnp
from jax.experimental import pallas as pl
from jax.experimental.pallas import tpu as pltpu

EPS = 1e-6          # torchvision ViT uses LayerNorm(eps=1e-6)
BF16 = jnp.bfloat16


def _layer_norm(x, g, b):
    # x: (S, D) or (B, D) f32 ; g, b: (1, D) f32
    mu = jnp.mean(x, axis=-1, keepdims=True)
    var = jnp.mean(jnp.square(x - mu), axis=-1, keepdims=True)
    return (x - mu) * jax.lax.rsqrt(var + EPS) * g + b


def _gelu_exact(x):
    return 0.5 * x * (1.0 + jax.lax.erf(x * (1.0 / math.sqrt(2.0))))


# ---------------------------------------------------------------------------
# Kernel 1: patch-embedding linear  o = x @ w + b, tiled over M (rows).
# conv_proj with stride == kernel_size is exactly a matmul over unfolded patches.
# ---------------------------------------------------------------------------
def _linear_kernel(x_ref, w_ref, b_ref, o_ref):
    o_ref[...] = (jnp.dot(x_ref[...].astype(BF16), w_ref[...],
                          preferred_element_type=jnp.float32)
                  + b_ref[...]).astype(o_ref.dtype)


def pallas_linear(x, w_bf16, b):
    m, k = x.shape
    k2, n = w_bf16.shape
    assert k == k2
    tm = min(m, 512)
    if m % tm != 0:          # demo shapes are tiny; fall back to a single block
        tm = m
    return pl.pallas_call(
        _linear_kernel,
        grid=(m // tm,),
        out_shape=jax.ShapeDtypeStruct((m, n), jnp.float32),
        in_specs=[pl.BlockSpec((tm, k), lambda i: (i, 0)),
                  pl.BlockSpec((k, n), lambda i: (0, 0)),
                  pl.BlockSpec((1, n), lambda i: (0, 0))],
        out_specs=pl.BlockSpec((tm, n), lambda i: (i, 0)),
        compiler_params=pltpu.CompilerParams(
            dimension_semantics=("parallel",)),
    )(x, w_bf16, b)


# ---------------------------------------------------------------------------
# Kernel 2: fused encoder stack.  grid = (B, L); the (1, S, D) output block is
# VMEM-resident across the inner (arbitrary) layer axis and used as the carry,
# so activations never round-trip HBM between layers.  Per-layer weights are
# streamed in bf16 via stacked (L, ...) arrays.
# ---------------------------------------------------------------------------
def _encoder_stack_kernel(x_ref,
                          ln1_g, ln1_b, qkv_w, qkv_b, out_w, out_b,
                          ln2_g, ln2_b, fc1_w, fc1_b, fc2_w, fc2_b,
                          o_ref, *, num_heads):
    layer = pl.program_id(1)

    @pl.when(layer == 0)
    def _():                                    # load the residual stream once
        o_ref[...] = x_ref[...]

    x = o_ref[0]                                # (S, D) f32 residual stream
    S, D = x.shape
    hd = D // num_heads
    scale = 1.0 / math.sqrt(hd)

    # --- self attention ---
    h = _layer_norm(x, ln1_g[0], ln1_b[0])                                # (S, D)
    qkv = (jnp.dot(h.astype(BF16), qkv_w[0],
                   preferred_element_type=jnp.float32) + qkv_b[0])        # (S, 3D)
    q = qkv[:, :D].reshape(S, num_heads, hd)
    k = qkv[:, D:2 * D].reshape(S, num_heads, hd)
    v = qkv[:, 2 * D:].reshape(S, num_heads, hd)

    # batched over heads: one MXU contraction instead of num_heads tiny matmuls
    s = jnp.einsum('qhd,khd->hqk', q.astype(BF16), k.astype(BF16),
                   preferred_element_type=jnp.float32) * scale            # (H,S,S)
    s = s - jnp.max(s, axis=-1, keepdims=True)
    e = jnp.exp(s)
    p = e * pl.reciprocal(jnp.sum(e, axis=-1, keepdims=True), approx=True)
    ctx = jnp.einsum('hqk,khd->qhd', p.astype(BF16), v.astype(BF16),
                     preferred_element_type=jnp.float32)                  # (S,H,hd)
    attn = ctx.reshape(S, D)
    attn = (jnp.dot(attn.astype(BF16), out_w[0],
                    preferred_element_type=jnp.float32) + out_b[0])
    x1 = x + attn                                                         # residual

    # --- MLP ---
    h2 = _layer_norm(x1, ln2_g[0], ln2_b[0])
    z = (jnp.dot(h2.astype(BF16), fc1_w[0],
                 preferred_element_type=jnp.float32) + fc1_b[0])
    z = _gelu_exact(z)
    z = (jnp.dot(z.astype(BF16), fc2_w[0],
                 preferred_element_type=jnp.float32) + fc2_b[0])
    o_ref[0] = x1 + z                                                     # residual


def encoder_stack(x, lp, *, num_heads):
    B, S, D = x.shape
    L = lp['ln1_g'].shape[0]
    names = ['ln1_g', 'ln1_b', 'qkv_w', 'qkv_b', 'out_w', 'out_b',
             'ln2_g', 'ln2_b', 'fc1_w', 'fc1_b', 'fc2_w', 'fc2_b']
    mm_weights = {'qkv_w', 'out_w', 'fc1_w', 'fc2_w'}
    arrays = [lp[n].astype(BF16) if n in mm_weights else lp[n] for n in names]

    def w_spec(a):
        nd = a.ndim
        blk = (1,) + a.shape[1:]
        return pl.BlockSpec(blk, lambda b, l, _nd=nd: (l,) + (0,) * (_nd - 1))

    in_specs = [pl.BlockSpec((1, S, D), lambda b, l: (b, 0, 0))]
    in_specs += [w_spec(a) for a in arrays]

    kernel = functools.partial(_encoder_stack_kernel, num_heads=num_heads)
    return pl.pallas_call(
        kernel,
        grid=(B, L),                       # l is the inner (fastest) loop
        out_shape=jax.ShapeDtypeStruct((B, S, D), jnp.float32),
        in_specs=in_specs,
        out_specs=pl.BlockSpec((1, S, D), lambda b, l: (b, 0, 0)),
        compiler_params=pltpu.CompilerParams(
            dimension_semantics=("parallel", "arbitrary")),
    )(x, *arrays)


# ---------------------------------------------------------------------------
# Kernel 3: final LayerNorm (cls token) + folded (heads Linear ∘ ResizeBlock)
# affine map, gridded over the 64800-wide output dimension.
# ---------------------------------------------------------------------------
def _head_resize_kernel(cls_ref, ln_g, ln_b, w_ref, b_ref, o_ref):
    h = _layer_norm(cls_ref[...], ln_g[...], ln_b[...])        # (B, D) f32
    o_ref[...] = (jnp.dot(h.astype(BF16), w_ref[...],
                          preferred_element_type=jnp.float32) + b_ref[...])


def head_resize(cls, ln_g, ln_b, w_fold_bf16, b_fold, *, tile_n=2048):
    B, D = cls.shape
    n = w_fold_bf16.shape[1]
    n_tiles = pl.cdiv(n, tile_n)
    n_pad = n_tiles * tile_n
    if n_pad != n:           # pad to a lane-dense multiple of the tile width
        w_fold_bf16 = jnp.pad(w_fold_bf16, ((0, 0), (0, n_pad - n)))
        b_fold = jnp.pad(b_fold, ((0, 0), (0, n_pad - n)))
    out = pl.pallas_call(
        _head_resize_kernel,
        grid=(n_tiles,),
        out_shape=jax.ShapeDtypeStruct((B, n_pad), jnp.float32),
        in_specs=[pl.BlockSpec((B, D), lambda j: (0, 0)),
                  pl.BlockSpec((1, D), lambda j: (0, 0)),
                  pl.BlockSpec((1, D), lambda j: (0, 0)),
                  pl.BlockSpec((D, tile_n), lambda j: (0, j)),
                  pl.BlockSpec((1, tile_n), lambda j: (0, j))],
        out_specs=pl.BlockSpec((B, tile_n), lambda j: (0, j)),
        compiler_params=pltpu.CompilerParams(
            dimension_semantics=("parallel",)),
    )(cls, ln_g, ln_b, w_fold_bf16, b_fold)
    return out[:, :n]


# ---------------------------------------------------------------------------
# Full forward (JAX glue around the Pallas kernels)
# ---------------------------------------------------------------------------
def custom_vit_forward(x, params, config):
    B, C, H, W = x.shape
    P = config['patch_size']
    D = config['hidden_dim']
    nh, nw = H // P, W // P
    nP = nh * nw

    # Patch unfold (NCHW -> (B*nP, C*P*P)), row-major over (nh, nw) like torchvision.
    patches = x.reshape(B, C, nh, P, nw, P)
    patches = patches.transpose(0, 2, 4, 1, 3, 5).reshape(B * nP, C * P * P)

    # conv_proj as a matmul (stride == kernel_size)
    tok = pallas_linear(patches, params['patch_w'].astype(BF16), params['patch_b'])
    tok = tok.reshape(B, nP, D)

    # prepend class token, add positional embedding (dropout p=0.05 -> identity, eval)
    cls = jnp.broadcast_to(params['class_token'], (B, 1, D))
    seq = jnp.concatenate([cls, tok], axis=1) + params['pos_embedding']

    # all encoder layers in one fused pallas_call
    seq = encoder_stack(seq, params['layers'], num_heads=config['num_heads'])

    cls_out = seq[:, 0, :]                                           # (B, D)

    # Exact fold of heads Linear followed by ResizeBlock Linear:
    #   (h @ Wh + bh) @ Wr + br == h @ (Wh @ Wr) + (bh @ Wr + br)
    # (weight prep in JAX glue; at real sizes this would be precomputed once)
    w_fold = jnp.dot(params['head_w'], params['resize_w'])           # (D, 64800)
    b_fold = jnp.dot(params['head_b'], params['resize_w']) + params['resize_b']

    return head_resize(cls_out,
                       params['final_ln_g'], params['final_ln_b'],
                       w_fold.astype(BF16), b_fold)


# ---------------------------------------------------------------------------
# Deterministic synthetic parameter initialization (shapes from __init__);
# per-layer weights are stored stacked over the layer axis for the fused kernel.
# ---------------------------------------------------------------------------
def init_params(key, config, resize_out=64800):
    D = config['hidden_dim']
    M = config['mlp_dim']
    P = config['patch_size']
    C = 3
    nP = (config['image_size'] // P) ** 2
    S = nP + 1
    NC = config['num_classes']
    L = config['num_layers']

    keys = iter(jax.random.split(key, 32))

    def nrm(shape, std=0.02):
        return jax.random.normal(next(keys), shape, jnp.float32) * std

    params = dict(
        patch_w=nrm((C * P * P, D)),
        patch_b=nrm((1, D)),
        class_token=nrm((1, 1, D)),
        pos_embedding=nrm((1, S, D)),
        final_ln_g=jnp.ones((1, D), jnp.float32),
        final_ln_b=jnp.zeros((1, D), jnp.float32),
        head_w=nrm((D, NC)),
        head_b=nrm((1, NC)),
        resize_w=nrm((NC, resize_out)),
        resize_b=nrm((1, resize_out)),
        layers=dict(
            ln1_g=jnp.ones((L, 1, D), jnp.float32),
            ln1_b=jnp.zeros((L, 1, D), jnp.float32),
            qkv_w=nrm((L, D, 3 * D)),
            qkv_b=nrm((L, 1, 3 * D)),
            out_w=nrm((L, D, D)),
            out_b=nrm((L, 1, D)),
            ln2_g=jnp.ones((L, 1, D), jnp.float32),
            ln2_b=jnp.zeros((L, 1, D), jnp.float32),
            fc1_w=nrm((L, D, M)),
            fc1_b=nrm((L, 1, M)),
            fc2_w=nrm((L, M, D)),
            fc2_b=nrm((L, 1, D)),
        ),
    )
    return params


if __name__ == "__main__":
    config = dict(image_size=16, patch_size=8, num_layers=2, num_heads=4,
                  hidden_dim=32, mlp_dim=64, num_classes=16)
    key = jax.random.PRNGKey(0)
    kx, kp = jax.random.split(key)

    x = jax.random.normal(kx, (2, 3, 16, 16), jnp.float32)  # NCHW like PyTorch
    params = init_params(kp, config)

    out = custom_vit_forward(x, params, config)
    out = jax.block_until_ready(out)
    assert out.shape == (2, 64800), out.shape
    assert bool(jnp.all(jnp.isfinite(out)))
    print("KERNEL_OK")
</pallas_src>

<mosaic_0001>
module attributes {stable_mosaic.version = 11 : i64} {
  func.func @_linear_kernel(%arg0: i32, %arg1: memref<8x192xf32, #tpu.memory_space<vmem>>, %arg2: memref<192x32xbf16, #tpu.memory_space<vmem>>, %arg3: memref<1x32xf32, #tpu.memory_space<vmem>>, %arg4: memref<8x32xf32, #tpu.memory_space<vmem>>) attributes {dimension_semantics = [#tpu.dimension_semantics<parallel>], iteration_bounds = array<i64: 1>, scalar_prefetch = 0 : i64, scratch_operands = 0 : i64, tpu.core_type = #tpu.core_type<tc>, window_params = [{transform_indices = @transform_0, window_bounds = array<i64: 8, 192>}, {pipeline_mode = #tpu.pipeline_mode<synchronous>, transform_indices = @transform_1, window_bounds = array<i64: 192, 32>}, {pipeline_mode = #tpu.pipeline_mode<synchronous>, transform_indices = @transform_2, window_bounds = array<i64: 1, 32>}, {transform_indices = @transform_3, window_bounds = array<i64: 8, 32>}]} {
    %c0 = arith.constant 0 : index
    %c0_0 = arith.constant 0 : index
    %0 = vector.load %arg1[%c0, %c0_0] : memref<8x192xf32, #tpu.memory_space<vmem>>, vector<8x192xf32>
    %1 = arith.truncf %0 : vector<8x192xf32> to vector<8x192xbf16>
    %c0_1 = arith.constant 0 : index
    %c0_2 = arith.constant 0 : index
    %2 = vector.load %arg2[%c0_1, %c0_2] : memref<192x32xbf16, #tpu.memory_space<vmem>>, vector<192x32xbf16>
    %cst = arith.constant dense<0.000000e+00> : vector<8x32xf32>
    %3 = tpu.matmul %1, %2, %cst {dimension_numbers = #tpu.dot_dimension_numbers<[1], [0], [0], [1], [0, 0, 1, 1], [], []>} : vector<8x192xbf16>, vector<192x32xbf16>, vector<8x32xf32> -> vector<8x32xf32>
    %c0_3 = arith.constant 0 : index
    %c0_4 = arith.constant 0 : index
    %4 = vector.load %arg3[%c0_3, %c0_4] : memref<1x32xf32, #tpu.memory_space<vmem>>, vector<1x32xf32>
    %5 = vector.broadcast %4 : vector<1x32xf32> to vector<8x32xf32>
    %6 = arith.addf %3, %5 : vector<8x32xf32>
    %c0_5 = arith.constant 0 : index
    %c0_6 = arith.constant 0 : index
    %7 = vector.load %arg4[%c0_5, %c0_6] : memref<8x32xf32, #tpu.memory_space<vmem>>, vector<8x32xf32>
    tpu.vector_store %arg4[%c0_5, %c0_6], %6 {strides = array<i32>} : memref<8x32xf32, #tpu.memory_space<vmem>>, vector<8x32xf32>,
    return
  }
  func.func @transform_0(%arg0: i32) -> (i32, i32) {
    %c0_i32 = arith.constant 0 : i32
    %c0_i32_0 = arith.constant 0 : i32
    return %arg0, %c0_i32 : i32, i32
  }
  func.func @transform_1(%arg0: i32) -> (i32, i32) {
    %c0_i32 = arith.constant 0 : i32
    %c0_i32_0 = arith.constant 0 : i32
    %c0_i32_1 = arith.constant 0 : i32
    return %c0_i32, %c0_i32_0 : i32, i32
  }
  func.func @transform_2(%arg0: i32) -> (i32, i32) {
    %c0_i32 = arith.constant 0 : i32
    %c0_i32_0 = arith.constant 0 : i32
    %c0_i32_1 = arith.constant 0 : i32
    return %c0_i32, %c0_i32_0 : i32, i32
  }
  func.func @transform_3(%arg0: i32) -> (i32, i32) {
    %c0_i32 = arith.constant 0 : i32
    %c0_i32_0 = arith.constant 0 : i32
    return %arg0, %c0_i32 : i32, i32
  }
}

</mosaic_0001>

<bundles_post_ra>
// kernel: tpu_custom_call.1
= control target key start
LH: loop header
LB: loop body
LE: loop exit
PB: predicated region body
PF: predicated region fallthrough
CT: control target
= control target key end

     0   :  { %v235_v1 = vmov 0   ;;  %vm123_vm0 = vcmask 523264   ;;  %s314_s0 = inlined_call_operand.vmem [shape: f32[8,192], index: 0, kind: input, shape index: {}]   ;;  %s315_s1 = inlined_call_operand.vmem [shape: bf16[192,32], index: 1, kind: input, shape index: {}]   ;;  %s316_s2 = inlined_call_operand.vmem [shape: f32[1,32], index: 2, kind: input, shape index: {}]   ;;  %s317_s3 = inlined_call_operand.hbm [shape: f32[8,32], index: 3, kind: output, shape index: {}]  }
   0x1   :  { %v199_v0 = vld [vmem:[%s315_s1] sm:$0xff]   ;;  %127 = vmatprep.subr.bf16.mxu0 %v235_v1  ;;  %v200_v2 = vld [vmem:[%s315_s1 + $0x8] sm:$0xff]   ;;  %v201_v3 = vld [vmem:[%s315_s1 + $0x10] sm:$0xff]  }
   0x2   :  { %128 = vmatpush1.bf16.msra.mxu0 %v199_v0  ;;  %v202_v4 = vld [vmem:[%s315_s1 + $0x18] sm:$0xff]   ;;  %v17_v5 = vld [vmem:[%s314_s0 + $0x8] sm:$0xff] }
   0x3   :  { %129 = vmatprep.subr.bf16.mxu0 %v235_v1  ;;  %v19_v6 = vpack.c.bf16 %v17_v5, %v17_v5 }
   0x6   :  { %130 = vmatpush1.bf16.msra.mxu0 %v200_v2 }
   0x7   :  { %131 = vmatprep.subr.bf16.mxu0 %v235_v1 }
   0xa   :  { %132 = vmatpush1.bf16.msra.mxu0 %v201_v3 }
   0xb   :  { %133 = vmatprep.subr.bf16.mxu0 %v235_v1 }
   0xc   :  { %8 = vsyncpa [#allocation3], 0  ;;  %v203_v7 = vld [vmem:[%s315_s1 + $0x20] sm:$0xff]   ;;  %196 = vmatprep.mubr.msk.bf16.mxu0 %vm123_vm0, %v19_v6  ;;  %v204_v8 = vld [vmem:[%s315_s1 + $0x28] sm:$0xff]   ;;  %s236_s15 = smov [#allocation2]   ;;  %vm167_vm1 = vcmask 261120  }
   0xd   :  { %v205_v9 = vld [vmem:[%s315_s1 + $0x30] sm:$0xff]   ;;  %v206_v10 = vld [vmem:[%s315_s1 + $0x38] sm:$0xff]   ;;  %v207_v11 = vld [vmem:[%s315_s1 + $0x40] sm:$0xff]   ;;  %s175_s16 = sshll.u32 %s236_s15, 4  ;;  %s176_s16 = int_to_ptr.vmem [resolvable:$true] %s175_s16 }
   0xe   :  { %134 = vmatpush1.bf16.msra.mxu0 %v202_v4  ;;  %v208_v12 = vld [vmem:[%s315_s1 + $0x48] sm:$0xff]   ;;  %v209_v13 = vld [vmem:[%s315_s1 + $0x50] sm:$0xff]   ;;  %v210_v14 = vld [vmem:[%s315_s1 + $0x58] sm:$0xff]   ;;  %s211_s1 = scalar_lea.vmem %s176_s16, 128  ;;  %p216_p1 = scmp.lt.s32.totalorder %s176_s16, %s176_s16 }
   0xf   :  { %135 = vmatprep.subr.bf16.mxu0 %v235_v1  ;;  %v16_v15 = vld [vmem:[%s314_s0] sm:$0xff]  ;;  %p212_p0 = scmp.ne.s32.totalorder %s176_s16, %s211_s1  ;;  %p217_p2 = scmp.lt.s32.totalorder %s211_s1, %s211_s1 }
  0x10   :  { %v18_v16 = vpack.c.bf16 %v16_v15, %v16_v15  ;;  %v183_v17 = vld [vmem:[%s316_s2] ss:$0 sm:$0xff] }
  0x11   :  { %p218_p3 = por %p217_p2, %p216_p1 }
  0x12   :  { %136 = vmatpush1.bf16.msra.mxu0 %v203_v7 }
  0x13   :  { %137 = vmatprep.subr.bf16.mxu0 %v235_v1  ;;  %p219_p4 = pnand %p218_p3, %p212_p0 }
  0x16   :  { %138 = vmatpush1.bf16.msra.mxu0 %v204_v8 }
  0x17   :  { %139 = vmatprep.subr.bf16.mxu0 %v235_v1 }
  0x1a   :  { %140 = vmatpush1.bf16.msra.mxu0 %v205_v9 }
  0x1b   :  { %141 = vmatprep.subr.bf16.mxu0 %v235_v1 }
  0x1e   :  { %142 = vmatpush1.bf16.msra.mxu0 %v206_v10 }
  0x1f   :  { %143 = vmatprep.subr.bf16.mxu0 %v235_v1 }
  0x22   :  { %144 = vmatpush1.bf16.msra.mxu0 %v207_v11 }
  0x23   :  { %145 = vmatprep.subr.bf16.mxu0 %v235_v1 }
  0x26   :  { %146 = vmatpush1.bf16.msra.mxu0 %v208_v12 }
  0x27   :  { %147 = vmatprep.subr.bf16.mxu0 %v235_v1 }
  0x2a   :  { %148 = vmatpush1.bf16.msra.mxu0 %v209_v13 }
  0x2b   :  { %149 = vmatprep.subr.bf16.mxu0 %v235_v1 }
  0x2e   :  { %150 = vmatpush1.bf16.msra.mxu0 %v210_v14 }
  0x31   :  { %160 = vmatmul.mubr.bf16.vlgmr.msra.gmra.mrb[0].mxu0 %v18_v16 }
 0x104   :  { %v161_v18 = vpop.f32.mrb[0].mxu0 }
 0x105   :  { %v162_v19 = vadd.f32 %v183_v17, %v161_v18  ;;  %v163_v20 = vpop.f32.mrb[1].mxu0 }
 0x106   :  { %v164_v21 = vpop.f32.mrb[2].mxu0 }
 0x107   :  { %v165_v22 = vpop.f32.mrb[3].mxu0  ;;  %168 = vst.msk [vmem:[#allocation2] sm:$0xff] %vm167_vm1, %v162_v19 }
 0x108   :  { %222 = shalt.err (!%p219_p4)
}
 0x109   :  { %s223_s2 = scalar_lea.hbm %s317_s3, 128 }
 0x10a   :  { %p224_p5 = scmp.ne.s32.totalorder %s317_s3, %s223_s2  ;;  %p227_p6 = scmp.lt.u32.totalorder %s223_s2, %s317_s3 }
 0x10c   :  { %p229_p7 = pnand %p227_p6, %p224_p5 }
 0x10e   :  { %232 = shalt.err (!%p229_p7)
}
 0x10f   :  { %178 = dma.vmem_to_hbm [thread:$0]  %s176_s16, 128, %s317_s3, [#allocation3]  }
 0x110   :  { %233 = dma.done.wait [#allocation3], 128  }
 0x111   :  { %234 = vsyncadd [#allocation3], 4294967168 }
 0x112   :  { %182 = vsyncpa [#allocation3], 1 }

</bundles_post_ra>
